<compile_context>
chip_gen: v5e
topology: v5e:2x2
jax: 0.10.0
libtpu: 0.0.40
codegen_flags: <defaults>
</compile_context>

<pallas_src>
import jax
import jax.numpy as jnp
from jax.experimental import pallas as pl
from jax.experimental.pallas import tpu as pltpu

LANE = 128  # TPU vreg lane width


# ------------------------------ Pallas kernel -------------------------------

def fused_network_kernel(p_ref, wc_ref, bc_ref, pool_ref, wf_ref, bf_ref,
                         o_ref, feat_acc):
    """Fused feature extractor + fc head.

    Grid: (num_row_tiles,) over rows of the (B*HW, K) patch matrix — a
    reduction axis (pooled features accumulate across tiles).

    p_ref    : (TR, K)    bf16  im2col patch rows for this tile
    wc_ref   : (K, Cf)    bf16  conv weight as a matmul operand
    bc_ref   : (1, Cf)    f32   conv bias
    pool_ref : (B, TR)    f32   segmented average-pool matrix slice (1/HW)
    wf_ref   : (Cf, NCp)  bf16  fc weight, classes zero-padded to 128 lanes
    bf_ref   : (1, NCp)   f32   fc bias, zero-padded
    o_ref    : (B, NCp)   f32   padded logits (lane-dense, resident block)
    feat_acc : (B, Cf)    f32   VMEM scratch: pooled-feature accumulator
    """
    step = pl.program_id(0)

    @pl.when(step == 0)
    def _init():
        feat_acc[...] = jnp.zeros_like(feat_acc)

    # conv-as-matmul on the MXU (bf16 operands, f32 accumulate) + bias + ReLU.
    acts = jnp.dot(p_ref[...], wc_ref[...], preferred_element_type=jnp.float32)
    acts = jnp.maximum(acts + bc_ref[...], 0.0)

    # Segmented per-image average pool as a single matmul (1/HW baked into
    # pool_ref, so this is sum * reciprocal — no jnp.mean, no reshapes).
    feat_acc[...] += jnp.dot(pool_ref[...], acts,
                             preferred_element_type=jnp.float32)

    # Finalize on the last reduction step: fc head + lane-dense store.
    @pl.when(step == pl.num_programs(0) - 1)
    def _finalize():
        logits = jnp.dot(feat_acc[...].astype(jnp.bfloat16), wf_ref[...],
                         preferred_element_type=jnp.float32) + bf_ref[...]
        o_ref[...] = logits


# ------------------------------ glue (plain JAX) ----------------------------

def im2col_3x3(x):
    """x: [B, C, H, W] NCHW -> patches [B, H*W, C*9] (pad=1, stride=1)."""
    B, C, H, W = x.shape
    xp = jnp.pad(x, ((0, 0), (0, 0), (1, 1), (1, 1)))
    shards = [xp[:, :, di:di + H, dj:dj + W]
              for di in range(3) for dj in range(3)]
    p = jnp.stack(shards, axis=2)                      # [B, C, 9, H, W]
    p = p.transpose(0, 3, 4, 1, 2).reshape(B, H * W, C * 9)
    return p


def _pick_row_tile(R):
    """Largest row tile that keeps all BlockSpecs (8,128)-legal.

    The tile is both the second-to-last dim of the patches block (needs %8)
    and the last dim of the pool block (needs %128 or full extent), so pick a
    multiple of 128 that divides R, else fall back to the full extent.
    """
    for t in (512, 384, 256, 128):
        if R % t == 0:
            return t
    return R


def network_forward(x, params):
    """Forward pass equivalent to network.forward (NCHW float32 input)."""
    B, C, H, W = x.shape
    conv_w = params["conv_w"]      # [Cf, C, 3, 3]  (PyTorch layout)
    conv_b = params["conv_b"]      # [Cf]
    fc_w = params["fc_w"]          # [numclass, Cf] (PyTorch layout)
    fc_b = params["fc_b"]          # [numclass]

    Cf = conv_w.shape[0]
    Nc = fc_w.shape[0]
    HW = H * W
    K = C * 9
    R = B * HW
    NCp = ((Nc + LANE - 1) // LANE) * LANE   # lane-dense padded class dim

    TR = _pick_row_tile(R)
    G = R // TR

    # Patch matrix (bf16 halves the bytes of the im2col expansion; the
    # producer is eligible for XLA input fusion into the pallas_call below).
    patches = im2col_3x3(x).reshape(R, K).astype(jnp.bfloat16)       # (R, K)
    conv_w_mat = conv_w.reshape(Cf, K).T.astype(jnp.bfloat16)        # (K, Cf)
    conv_b_row = conv_b.reshape(1, Cf).astype(jnp.float32)           # (1, Cf)

    # Segmented mean-pool matrix: pool_mat[b, r] = 1/HW iff row r belongs to
    # image b.  Turns the per-image pooling into one MXU matmul per tile.
    pool_mat = jnp.repeat(jnp.eye(B, dtype=jnp.float32), HW, axis=1) / HW

    # fc weight/bias, classes zero-padded to a multiple of 128 lanes.
    fc_w_pad = jnp.zeros((Cf, NCp), jnp.bfloat16).at[:, :Nc].set(
        fc_w.T.astype(jnp.bfloat16))
    fc_b_pad = jnp.zeros((1, NCp), jnp.float32).at[:, :Nc].set(
        fc_b.reshape(1, Nc).astype(jnp.float32))

    logits_pad = pl.pallas_call(
        fused_network_kernel,
        out_shape=jax.ShapeDtypeStruct((B, NCp), jnp.float32),
        grid_spec=pltpu.PrefetchScalarGridSpec(
            num_scalar_prefetch=0,
            grid=(G,),
            in_specs=[
                pl.BlockSpec((TR, K), lambda i: (i, 0)),     # patches tile
                pl.BlockSpec((K, Cf), lambda i: (0, 0)),     # conv weight
                pl.BlockSpec((1, Cf), lambda i: (0, 0)),     # conv bias
                pl.BlockSpec((B, TR), lambda i: (0, i)),     # pool matrix tile
                pl.BlockSpec((Cf, NCp), lambda i: (0, 0)),   # fc weight (pad)
                pl.BlockSpec((1, NCp), lambda i: (0, 0)),    # fc bias (pad)
            ],
            # Same output block across the reduction axis -> stays VMEM
            # resident; written once in the finalize step.
            out_specs=pl.BlockSpec((B, NCp), lambda i: (0, 0)),
            scratch_shapes=[pltpu.VMEM((B, Cf), jnp.float32)],
        ),
        compiler_params=pltpu.CompilerParams(
            # Single grid axis is a reduction (pool accumulation).
            dimension_semantics=("arbitrary",),
            # Let XLA fuse the im2col producer (pad/stack/transpose/cast)
            # into the pallas_call instead of materializing it in HBM.
            allow_input_fusion=[True, False, False, False, False, False],
        ),
    )(patches, conv_w_mat, conv_b_row, pool_mat, fc_w_pad, fc_b_pad)

    return logits_pad[:, :Nc]


def reference_forward(x, params):
    """Pure-JAX f32 reference for correctness checking."""
    conv_w, conv_b = params["conv_w"], params["conv_b"]
    fc_w, fc_b = params["fc_w"], params["fc_b"]
    B, C, H, W = x.shape
    Cf = conv_w.shape[0]
    patches = im2col_3x3(x)                                   # [B, HW, C*9]
    acts = patches @ conv_w.reshape(Cf, -1).T + conv_b        # [B, HW, Cf]
    acts = jnp.maximum(acts, 0.0)
    feats = acts.mean(axis=1)                                 # [B, Cf]
    return feats @ fc_w.T + fc_b


# ----------------------------------- main ------------------------------------

if __name__ == "__main__":
    B, C, H, W = 2, 4, 16, 16     # input image (NCHW)
    C_FEAT = 32                   # feature_extractor.fc.in_features
    NUMCLASS = 10                 # numclass

    key = jax.random.PRNGKey(0)
    kx, kw1, kb1, kw2, kb2 = jax.random.split(key, 5)

    x = jax.random.normal(kx, (B, C, H, W), dtype=jnp.float32)
    params = {
        "conv_w": jax.random.normal(kw1, (C_FEAT, C, 3, 3), jnp.float32) * 0.1,
        "conv_b": jax.random.normal(kb1, (C_FEAT,), jnp.float32) * 0.1,
        "fc_w": jax.random.normal(kw2, (NUMCLASS, C_FEAT), jnp.float32) * 0.1,
        "fc_b": jax.random.normal(kb2, (NUMCLASS,), jnp.float32) * 0.1,
    }

    logits = jax.jit(network_forward)(x, params)
    logits = jax.block_until_ready(logits)

    ref = reference_forward(x, params)
    assert logits.shape == (B, NUMCLASS)
    # Tolerance loosened (bf16 MXU operands, f32 accumulation) as expected.
    assert jnp.allclose(logits, ref, atol=2e-2, rtol=2e-2), \
        float(jnp.max(jnp.abs(logits - ref)))

    print("KERNEL_OK")
</pallas_src>

<mosaic_0001>
module attributes {stable_mosaic.version = 11 : i64} {
  func.func @fused_network_kernel(%arg0: i32, %arg1: memref<512x36xbf16, #tpu.memory_space<vmem>>, %arg2: memref<36x32xbf16, #tpu.memory_space<vmem>>, %arg3: memref<1x32xf32, #tpu.memory_space<vmem>>, %arg4: memref<2x512xf32, #tpu.memory_space<vmem>>, %arg5: memref<32x128xbf16, #tpu.memory_space<vmem>>, %arg6: memref<1x128xf32, #tpu.memory_space<vmem>>, %arg7: memref<2x128xf32, #tpu.memory_space<vmem>>, %arg8: memref<2x32xf32, #tpu.memory_space<vmem>>) attributes {dimension_semantics = [#tpu.dimension_semantics<arbitrary>], iteration_bounds = array<i64: 1>, scalar_prefetch = 0 : i64, scratch_operands = 1 : i64, tpu.core_type = #tpu.core_type<tc>, window_params = [{transform_indices = @transform_0, window_bounds = array<i64: 512, 36>}, {pipeline_mode = #tpu.pipeline_mode<synchronous>, transform_indices = @transform_1, window_bounds = array<i64: 36, 32>}, {pipeline_mode = #tpu.pipeline_mode<synchronous>, transform_indices = @transform_2, window_bounds = array<i64: 1, 32>}, {transform_indices = @transform_3, window_bounds = array<i64: 2, 512>}, {pipeline_mode = #tpu.pipeline_mode<synchronous>, transform_indices = @transform_4, window_bounds = array<i64: 32, 128>}, {pipeline_mode = #tpu.pipeline_mode<synchronous>, transform_indices = @transform_5, window_bounds = array<i64: 1, 128>}, {pipeline_mode = #tpu.pipeline_mode<synchronous>, transform_indices = @transform_6, window_bounds = array<i64: 2, 128>}]} {
    %c0_i32 = arith.constant 0 : i32
    %0 = arith.cmpi eq, %arg0, %c0_i32 : i32
    %1 = arith.extui %0 : i1 to i32
    %c0_i32_0 = arith.constant 0 : i32
    %2 = arith.cmpi ne, %1, %c0_i32_0 : i32
    scf.if %2 {
      %cst_16 = arith.constant 0.000000e+00 : f32
      %19 = vector.broadcast %cst_16 : f32 to vector<2x32xf32>
      %c0_17 = arith.constant 0 : index
      %c0_18 = arith.constant 0 : index
      %20 = vector.load %arg8[%c0_17, %c0_18] : memref<2x32xf32, #tpu.memory_space<vmem>>, vector<2x32xf32>
      tpu.vector_store %arg8[%c0_17, %c0_18], %19 {strides = array<i32>} : memref<2x32xf32, #tpu.memory_space<vmem>>, vector<2x32xf32>,
    } else {
    }
    %c0 = arith.constant 0 : index
    %c0_1 = arith.constant 0 : index
    %3 = vector.load %arg1[%c0, %c0_1] : memref<512x36xbf16, #tpu.memory_space<vmem>>, vector<512x36xbf16>
    %c0_2 = arith.constant 0 : index
    %c0_3 = arith.constant 0 : index
    %4 = vector.load %arg2[%c0_2, %c0_3] : memref<36x32xbf16, #tpu.memory_space<vmem>>, vector<36x32xbf16>
    %cst = arith.constant dense<0.000000e+00> : vector<512x32xf32>
    %5 = tpu.matmul %3, %4, %cst {dimension_numbers = #tpu.dot_dimension_numbers<[1], [0], [0], [1], [0, 0, 1, 1], [], []>} : vector<512x36xbf16>, vector<36x32xbf16>, vector<512x32xf32> -> vector<512x32xf32>
    %c0_4 = arith.constant 0 : index
    %c0_5 = arith.constant 0 : index
    %6 = vector.load %arg3[%c0_4, %c0_5] : memref<1x32xf32, #tpu.memory_space<vmem>>, vector<1x32xf32>
    %7 = vector.broadcast %6 : vector<1x32xf32> to vector<512x32xf32>
    %8 = arith.addf %5, %7 : vector<512x32xf32>
    %cst_6 = arith.constant 0.000000e+00 : f32
    %9 = vector.broadcast %cst_6 : f32 to vector<512x32xf32>
    %10 = arith.maximumf %8, %9 : vector<512x32xf32>
    %c0_7 = arith.constant 0 : index
    %c0_8 = arith.constant 0 : index
    %11 = vector.load %arg8[%c0_7, %c0_8] : memref<2x32xf32, #tpu.memory_space<vmem>>, vector<2x32xf32>
    %c0_9 = arith.constant 0 : index
    %c0_10 = arith.constant 0 : index
    %12 = vector.load %arg4[%c0_9, %c0_10] : memref<2x512xf32, #tpu.memory_space<vmem>>, vector<2x512xf32>
    %cst_11 = arith.constant dense<0.000000e+00> : vector<2x32xf32>
    %13 = tpu.matmul %12, %10, %cst_11 {dimension_numbers = #tpu.dot_dimension_numbers<[1], [0], [0], [1], [0, 0, 1, 1], [], []>} : vector<2x512xf32>, vector<512x32xf32>, vector<2x32xf32> -> vector<2x32xf32>
    %14 = arith.addf %11, %13 : vector<2x32xf32>
    %c0_12 = arith.constant 0 : index
    %c0_13 = arith.constant 0 : index
    %15 = vector.load %arg8[%c0_12, %c0_13] : memref<2x32xf32, #tpu.memory_space<vmem>>, vector<2x32xf32>
    tpu.vector_store %arg8[%c0_12, %c0_13], %14 {strides = array<i32>} : memref<2x32xf32, #tpu.memory_space<vmem>>, vector<2x32xf32>,
    %c0_i32_14 = arith.constant 0 : i32
    %16 = arith.cmpi eq, %arg0, %c0_i32_14 : i32
    %17 = arith.extui %16 : i1 to i32
    %c0_i32_15 = arith.constant 0 : i32
    %18 = arith.cmpi ne, %17, %c0_i32_15 : i32
    scf.if %18 {
      %c0_16 = arith.constant 0 : index
      %c0_17 = arith.constant 0 : index
      %19 = vector.load %arg8[%c0_16, %c0_17] : memref<2x32xf32, #tpu.memory_space<vmem>>, vector<2x32xf32>
      %20 = arith.truncf %19 : vector<2x32xf32> to vector<2x32xbf16>
      %c0_18 = arith.constant 0 : index
      %c0_19 = arith.constant 0 : index
      %21 = vector.load %arg5[%c0_18, %c0_19] : memref<32x128xbf16, #tpu.memory_space<vmem>>, vector<32x128xbf16>
      %cst_20 = arith.constant dense<0.000000e+00> : vector<2x128xf32>
      %22 = tpu.matmul %20, %21, %cst_20 {dimension_numbers = #tpu.dot_dimension_numbers<[1], [0], [0], [1], [0, 0, 1, 1], [], []>} : vector<2x32xbf16>, vector<32x128xbf16>, vector<2x128xf32> -> vector<2x128xf32>
      %c0_21 = arith.constant 0 : index
      %c0_22 = arith.constant 0 : index
      %23 = vector.load %arg6[%c0_21, %c0_22] : memref<1x128xf32, #tpu.memory_space<vmem>>, vector<1x128xf32>
      %24 = vector.broadcast %23 : vector<1x128xf32> to vector<2x128xf32>
      %25 = arith.addf %22, %24 : vector<2x128xf32>
      %c0_23 = arith.constant 0 : index
      %c0_24 = arith.constant 0 : index
      %26 = vector.load %arg7[%c0_23, %c0_24] : memref<2x128xf32, #tpu.memory_space<vmem>>, vector<2x128xf32>
      tpu.vector_store %arg7[%c0_23, %c0_24], %25 {strides = array<i32>} : memref<2x128xf32, #tpu.memory_space<vmem>>, vector<2x128xf32>,
    } else {
    }
    return
  }
  func.func @transform_0(%arg0: i32) -> (i32, i32) {
    %c0_i32 = arith.constant 0 : i32
    %c0_i32_0 = arith.constant 0 : i32
    return %arg0, %c0_i32 : i32, i32
  }
  func.func @transform_1(%arg0: i32) -> (i32, i32) {
    %c0_i32 = arith.constant 0 : i32
    %c0_i32_0 = arith.constant 0 : i32
    %c0_i32_1 = arith.constant 0 : i32
    return %c0_i32, %c0_i32_0 : i32, i32
  }
  func.func @transform_2(%arg0: i32) -> (i32, i32) {
    %c0_i32 = arith.constant 0 : i32
    %c0_i32_0 = arith.constant 0 : i32
    %c0_i32_1 = arith.constant 0 : i32
    return %c0_i32, %c0_i32_0 : i32, i32
  }
  func.func @transform_3(%arg0: i32) -> (i32, i32) {
    %c0_i32 = arith.constant 0 : i32
    %c0_i32_0 = arith.constant 0 : i32
    return %c0_i32, %arg0 : i32, i32
  }
  func.func @transform_4(%arg0: i32) -> (i32, i32) {
    %c0_i32 = arith.constant 0 : i32
    %c0_i32_0 = arith.constant 0 : i32
    %c0_i32_1 = arith.constant 0 : i32
    return %c0_i32, %c0_i32_0 : i32, i32
  }
  func.func @transform_5(%arg0: i32) -> (i32, i32) {
    %c0_i32 = arith.constant 0 : i32
    %c0_i32_0 = arith.constant 0 : i32
    %c0_i32_1 = arith.constant 0 : i32
    return %c0_i32, %c0_i32_0 : i32, i32
  }
  func.func @transform_6(%arg0: i32) -> (i32, i32) {
    %c0_i32 = arith.constant 0 : i32
    %c0_i32_0 = arith.constant 0 : i32
    %c0_i32_1 = arith.constant 0 : i32
    return %c0_i32, %c0_i32_0 : i32, i32
  }
}

</mosaic_0001>

<bundles_post_ra>
// kernel: network_forward.1
= control target key start
LH: loop header
LB: loop body
LE: loop exit
PB: predicated region body
PF: predicated region fallthrough
CT: control target
= control target key end

     0   :  { %vm376_vm0 = vcmask 1041408   ;;  %s1387_s0 = inlined_call_operand.vmem [shape: bf16[512,36], index: 0, kind: input, shape index: {}]   ;;  %s1388_s1 = inlined_call_operand.vmem [shape: bf16[36,32], index: 1, kind: input, shape index: {}]   ;;  %s1389_s2 = inlined_call_operand.vmem [shape: f32[1,32], index: 2, kind: input, shape index: {}]   ;;  %s1390_s3 = inlined_call_operand.vmem [shape: f32[2,512], index: 3, kind: input, shape index: {}]   ;;  %s1391_s4 = inlined_call_operand.vmem [shape: bf16[32,128], index: 4, kind: input, shape index: {}]   ;;  %s1392_s5 = inlined_call_operand.vmem [shape: f32[1,128], index: 5, kind: input, shape index: {}]   ;;  %s1393_s6 = inlined_call_operand.hbm [shape: f32[2,128], index: 6, kind: output, shape index: {}]  }
   0x1   :  { %v99_v0 = vld [vmem:[%s1388_s1 + $0x10] sm:$0x3] }
   0x2   :  { %v273_v1 = vunpack.c.l.b16 %v99_v0 }
   0x4   :  { %v276_v2 = vpack.c.b16 %v273_v1, %v273_v1 }
   0x5   :  { %11 = vsyncpa [#allocation4], 0  ;;  %v977_v4 = vld [vmem:[%s1388_s1 + $0x8] sm:$0xff]  ;;  %v976_v5 = vld [vmem:[%s1388_s1] sm:$0xff]  ;;  %vm279_vm1 = vcmask 293888   ;;  %vm29_vm2 = vcmask 254976  }
   0x6   :  { %v378_v3 = vsel %vm376_vm0, %v276_v2, 0  ;;  %v944_v6 = vld [vmem:[%s1387_s0] sm:$0xff]  ;;  %v954_v7 = vld [vmem:[%s1387_s0 + $0x50] sm:$0xff]  ;;  %v959_v8 = vld [vmem:[%s1387_s0 + $0x78] sm:$0xff]  ;;  %vm733_vm3 = vcmask 261120   ;;  %s758_s26 = sshll.u32 %s1393_s6, 4  ;;  %s759_s26 = int_to_ptr.hbm [resolvable:$true] %s758_s26 }
   0x7   :  { %385 = vmatpush.bf16.msra.mxu0 %v378_v3  ;;  %980 = vmatpush.bf16.msra.mxu1 %v378_v3  ;;  %v967_v9 = vld [vmem:[%s1387_s0 + $0xb8] sm:$0xff]  ;;  %v945_v10 = vld [vmem:[%s1387_s0 + $0x8] sm:$0xff]  ;;  %v960_v12 = vld [vmem:[%s1387_s0 + $0x80] sm:$0xff] }
   0x8   :  { %981 = vmatpush.bf16.msra.mxu2 %v378_v3  ;;  %982 = vmatpush.bf16.msra.mxu3 %v378_v3  ;;  %v955_v11 = vld [vmem:[%s1387_s0 + $0x58] sm:$0xff]  ;;  %v968_v13 = vld [vmem:[%s1387_s0 + $0xc0] sm:$0xff]  ;;  %v946_v14 = vld [vmem:[%s1387_s0 + $0x10] sm:$0xff] }
   0x9   :  { %v956_v15 = vld [vmem:[%s1387_s0 + $0x60] sm:$0xff]  ;;  %v961_v16 = vld [vmem:[%s1387_s0 + $0x88] sm:$0xff]  ;;  %v947_v18 = vld [vmem:[%s1387_s0 + $0x18] sm:$0xff] }
   0xa   :  { %v969_v17 = vld [vmem:[%s1387_s0 + $0xc8] sm:$0xff]  ;;  %v962_v20 = vld [vmem:[%s1387_s0 + $0x90] sm:$0xff]  ;;  %v948_v22 = vld [vmem:[%s1387_s0 + $0x20] sm:$0xff] }
   0xb   :  { %386 = vmatpush.bf16.msra.mxu0 %v977_v4  ;;  %983 = vmatpush.bf16.msra.mxu1 %v977_v4  ;;  %v957_v19 = vld [vmem:[%s1387_s0 + $0x68] sm:$0xff]  ;;  %v970_v21 = vld [vmem:[%s1387_s0 + $0xd0] sm:$0xff]  ;;  %v963_v24 = vld [vmem:[%s1387_s0 + $0x98] sm:$0xff] }
   0xc   :  { %984 = vmatpush.bf16.msra.mxu2 %v977_v4  ;;  %985 = vmatpush.bf16.msra.mxu3 %v977_v4  ;;  %v958_v23 = vld [vmem:[%s1387_s0 + $0x70] sm:$0xff]  ;;  %v971_v25 = vld [vmem:[%s1387_s0 + $0xd8] sm:$0xff]  ;;  %v949_v26 = vld [vmem:[%s1387_s0 + $0x28] sm:$0xff] }
   0xd   :  { %v964_v27 = vld [vmem:[%s1387_s0 + $0xa0] sm:$0xff]  ;;  %v950_v29 = vld [vmem:[%s1387_s0 + $0x30] sm:$0xff]  ;;  %v965_v30 = vld [vmem:[%s1387_s0 + $0xa8] sm:$0xff] }
   0xe   :  { %v972_v28 = vld [vmem:[%s1387_s0 + $0xe0] sm:$0xff]  ;;  %v973_v31 = vld [vmem:[%s1387_s0 + $0xe8] sm:$0xff]  ;;  %v951_v32 = vld [vmem:[%s1387_s0 + $0x38] sm:$0xff] }
   0xf   :  { %387 = vmatpush.bf16.msra.mxu0 %v976_v5  ;;  %986 = vmatpush.bf16.msra.mxu1 %v976_v5  ;;  %v966_v33 = vld [vmem:[%s1387_s0 + $0xb0] sm:$0xff]  ;;  %v952_v35 = vld [vmem:[%s1387_s0 + $0x40] sm:$0xff]  ;;  %v975_v38 = vld [vmem:[%s1387_s0 + $0xf8] sm:$0xff] }
  0x10   :  { %987 = vmatpush.bf16.msra.mxu2 %v976_v5  ;;  %988 = vmatpush.bf16.msra.mxu3 %v976_v5  ;;  %v974_v34 = vld [vmem:[%s1387_s0 + $0xf0] sm:$0xff]  ;;  %v1200_v43 = vld [vmem:[%s1389_s2] ss:$0 sm:$0xff]  ;;  %v953_v48 = vld [vmem:[%s1387_s0 + $0x48] sm:$0xff] }
  0x12   :  { %903 = vmatmul.msk.bf16.vlgmr.msra.gmra.mxu0 %vm279_vm1, %v944_v6  ;;  %913 = vmatmul.msk.bf16.vlgmr.msra.gmra.mxu1 %vm279_vm1, %v954_v7 }
  0x13   :  { %918 = vmatmul.msk.bf16.vlgmr.msra.gmra.mxu2 %vm279_vm1, %v959_v8  ;;  %926 = vmatmul.msk.bf16.vlgmr.msra.gmra.mxu3 %vm279_vm1, %v967_v9 }
  0x22   :  { %904 = vmatmul.msk.bf16.gmra.mxu0 %vm279_vm1, %v945_v10  ;;  %914 = vmatmul.msk.bf16.gmra.mxu1 %vm279_vm1, %v955_v11 }
  0x23   :  { %919 = vmatmul.msk.bf16.gmra.mxu2 %vm279_vm1, %v960_v12  ;;  %927 = vmatmul.msk.bf16.gmra.mxu3 %vm279_vm1, %v968_v13 }
  0x32   :  { %905 = vmatmul.msk.bf16.gmra.mxu0 %vm279_vm1, %v946_v14  ;;  %915 = vmatmul.msk.bf16.gmra.mxu1 %vm279_vm1, %v956_v15 }
  0x33   :  { %920 = vmatmul.msk.bf16.gmra.mxu2 %vm279_vm1, %v961_v16  ;;  %928 = vmatmul.msk.bf16.gmra.mxu3 %vm279_vm1, %v969_v17 }
  0x42   :  { %906 = vmatmul.msk.bf16.gmra.mxu0 %vm279_vm1, %v947_v18  ;;  %916 = vmatmul.msk.bf16.gmra.mxu1 %vm279_vm1, %v957_v19 }
  0x43   :  { %921 = vmatmul.msk.bf16.gmra.mxu2 %vm279_vm1, %v962_v20  ;;  %929 = vmatmul.msk.bf16.gmra.mxu3 %vm279_vm1, %v970_v21 }
  0x52   :  { %907 = vmatmul.msk.bf16.gmra.mxu0 %vm279_vm1, %v948_v22  ;;  %917 = vmatmul.msk.bf16.gmra.mxu1 %vm279_vm1, %v958_v23 }
  0x53   :  { %922 = vmatmul.msk.bf16.gmra.mxu2 %vm279_vm1, %v963_v24  ;;  %930 = vmatmul.msk.bf16.gmra.mxu3 %vm279_vm1, %v971_v25 }
  0x62   :  { %908 = vmatmul.msk.bf16.gmra.mxu0 %vm279_vm1, %v949_v26 }
  0x63   :  { %923 = vmatmul.msk.bf16.gmra.mxu2 %vm279_vm1, %v964_v27  ;;  %931 = vmatmul.msk.bf16.gmra.mxu3 %vm279_vm1, %v972_v28 }
  0x72   :  { %909 = vmatmul.msk.bf16.gmra.mxu0 %vm279_vm1, %v950_v29 }
  0x73   :  { %924 = vmatmul.msk.bf16.gmra.mxu2 %vm279_vm1, %v965_v30  ;;  %932 = vmatmul.msk.bf16.gmra.mxu3 %vm279_vm1, %v973_v31 }
  0x82   :  { %910 = vmatmul.msk.bf16.gmra.mxu0 %vm279_vm1, %v951_v32 }
  0x83   :  { %925 = vmatmul.msk.bf16.gmra.mxu2 %vm279_vm1, %v966_v33  ;;  %933 = vmatmul.msk.bf16.gmra.mxu3 %vm279_vm1, %v974_v34 }
  0x8f   :  { %v1184_v36 = vpop.f32.mrf.mxu0  ;;  %v1186_v37 = vpop.f32.mrf.mxu1 }
  0x92   :  { %911 = vmatmul.msk.bf16.gmra.mxu0 %vm279_vm1, %v952_v35 }
  0x93   :  { %934 = vmatmul.msk.bf16.gmra.mxu3 %vm279_vm1, %v975_v38 }
  0x96   :  { %v464_v39 = vpop.f32.mrf.mxu2  ;;  %v504_v40 = vpop.f32.mrf.mxu3 }
  0x97   :  { %v1193_v41 = vpop.f32.mrf.mxu0  ;;  %v1195_v42 = vpop.f32.mrf.mxu1  ;;  %v465_v44 = vadd.f32 %v1200_v43, %v464_v39  ;;  %v505_v45 = vadd.f32 %v1200_v43, %v504_v40 }
  0x99   :  { %v579_v53 = vmax.f32 %v465_v44, 0.0  ;;  %v595_v55 = vmax.f32 %v505_v45, 0.0  ;;  %v442_v44 = vadd.f32 %v1200_v43, %v1195_v42 }
  0x9e   :  { %v466_v46 = vpop.f32.mrf.mxu2  ;;  %v506_v47 = vpop.f32.mrf.mxu3 }
  0x9f   :  { %v467_v49 = vadd.f32 %v1200_v43, %v466_v46  ;;  %v1208_v50 = vpop.f32.mrf.mxu0  ;;  %v444_v51 = vpop.f32.mrf.mxu1  ;;  %v507_v52 = vadd.f32 %v1200_v43, %v506_v47 }
  0xa0   :  { %v445_v38 = vadd.f32 %v1200_v43, %v444_v51 }
  0xa1   :  { %v580_v54 = vmax.f32 %v467_v49, 0.0  ;;  %v596_v56 = vmax.f32 %v507_v52, 0.0  ;;  %v440_v49 = vadd.f32 %v1200_v43, %v1186_v37  ;;  %v570_v52 = vmax.f32 %v442_v44, 0.0 }
  0xa2   :  { %912 = vmatmul.msk.bf16.gmra.mxu0 %vm279_vm1, %v953_v48  ;;  %v571_v45 = vmax.f32 %v445_v38, 0.0 }
  0xa3   :  { %645 = vmatpush.msrb.mxu2 %v580_v54  ;;  %665 = vmatpush.msrb.mxu3 %v596_v56  ;;  %v569_v51 = vmax.f32 %v440_v49, 0.0 }
  0xa5   :  { %646 = vmatpush.msrb.mxu2 %v579_v53  ;;  %666 = vmatpush.msrb.mxu3 %v595_v55 }
  0xa6   :  { %v1212_v57 = vpop.f32.mrf.mxu2  ;;  %v1214_v58 = vpop.f32.mrf.mxu3 }
  0xa7   :  { %v1216_v59 = vpop.f32.mrf.mxu0  ;;  %v446_v60 = vpop.f32.mrf.mxu1 }
  0xa8   :  { %v447_v34 = vadd.f32 %v1200_v43, %v446_v60 }
  0xaa   :  { %v572_v40 = vmax.f32 %v447_v34, 0.0 }
  0xae   :  { %v1218_v61 = vpop.f32.mrf.mxu2  ;;  %v1220_v62 = vpop.f32.mrf.mxu3 }
  0xaf   :  { %v1222_v63 = vpop.f32.mrf.mxu0  ;;  %v449_v0 = vpop.f32.mrf.mxu1 }
  0xb0   :  { %v450_v29 = vadd.f32 %v1200_v43, %v449_v0 }
  0xb2   :  { %v573_v39 = vmax.f32 %v450_v29, 0.0 }
  0xb6   :  { %v1224_v1 = vpop.f32.mrf.mxu2  ;;  %v1226_v2 = vpop.f32.mrf.mxu3 }
  0xb7   :  { %v1228_v3 = vpop.f32.mrf.mxu0  ;;  %v451_v4 = vpop.f32.mrf.mxu1 }
  0xb8   :  { %v452_v27 = vadd.f32 %v1200_v43, %v451_v4 }
  0xba   :  { %v574_v35 = vmax.f32 %v452_v27, 0.0 }
  0xbe   :  { %v1230_v5 = vpop.f32.mrf.mxu2  ;;  %v1232_v6 = vpop.f32.mrf.mxu3 }
  0xbf   :  { %v1234_v7 = vpop.f32.mrf.mxu0  ;;  %v454_v8 = vpop.f32.mrf.mxu1 }
  0xc0   :  { %v455_v24 = vadd.f32 %v1200_v43, %v454_v8 }
  0xc2   :  { %v575_v30 = vmax.f32 %v455_v24, 0.0 }
  0xc6   :  { %v1236_v9 = vpop.f32.mrf.mxu2  ;;  %v1238_v10 = vpop.f32.mrf.mxu3 }
  0xc7   :  { %v1240_v11 = vpop.f32.mrf.mxu0  ;;  %v456_v12 = vpop.f32.mrf.mxu1 }
  0xc8   :  { %v457_v22 = vadd.f32 %v1200_v43, %v456_v12 }
  0xca   :  { %v576_v28 = vmax.f32 %v457_v22, 0.0 }
  0xce   :  { %v1242_v13 = vpop.f32.mrf.mxu2  ;;  %v1244_v14 = vpop.f32.mrf.mxu3 }
  0xcf   :  { %v1246_v15 = vpop.f32.mrf.mxu0  ;;  %v459_v16 = vpop.f32.mrf.mxu1 }
  0xd0   :  { %v460_v17 = vadd.f32 %v1200_v43, %v459_v16 }
  0xd2   :  { %v577_v25 = vmax.f32 %v460_v17, 0.0 }
  0xd6   :  { %v1249_v18 = vpop.f32.mrf.mxu2  ;;  %v1251_v19 = vpop.f32.mrf.mxu3 }
  0xd7   :  { %v1253_v20 = vpop.f32.mrf.mxu0  ;;  %v461_v21 = vpop.f32.mrf.mxu1 }
  0xd8   :  { %v462_v23 = vadd.f32 %v1200_v43, %v461_v21 }
  0xda   :  { %v578_v26 = vmax.f32 %v462_v23, 0.0 }
  0xdc   :  { %647 = vmatpush.msrb.mxu2 %v578_v26 }
  0xde   :  { %v1260_v31 = vpop.f32.mrf.mxu2  ;;  %648 = vmatpush.msrb.mxu2 %v577_v25  ;;  %v1262_v32 = vpop.f32.mrf.mxu3 }
  0xdf   :  { %v414_v33 = vpop.f32.mrf.mxu0 }
  0xe0   :  { %649 = vmatpush.msrb.mxu2 %v576_v28  ;;  %v415_v38 = vadd.f32 %v1200_v43, %v414_v33  ;;  %v614_v33 = vld [vmem:[%s1390_s3] sm:$0xff] }
  0xe1   :  { %616 = vst [vmem:[#allocation1] ss:$4 sm:$0xff] %v614_v33 }
  0xe2   :  { %650 = vmatpush.msrb.mxu2 %v575_v30 }
  0xe4   :  { %651 = vmatpush.msrb.mxu2 %v574_v35 }
  0xe6   :  { %v489_v46 = vpop.f32.mrf.mxu2  ;;  %652 = vmatpush.msrb.mxu2 %v573_v39  ;;  %v1268_v47 = vpop.f32.mrf.mxu3 }
  0xe7   :  { %v416_v48 = vpop.f32.mrf.mxu0 }
  0xe8   :  { %653 = vmatpush.msrb.mxu2 %v572_v40  ;;  %v417_v27 = vadd.f32 %v1200_v43, %v416_v48  ;;  %v412_v48 = vadd.f32 %v1200_v43, %v1253_v20  ;;  %v407_v20 = vadd.f32 %v1200_v43, %v1240_v11  ;;  %v402_v11 = vadd.f32 %v1200_v43, %v1228_v3 }
  0xe9   :  { %v397_v3 = vadd.f32 %v1200_v43, %v1216_v59  ;;  %v392_v59 = vadd.f32 %v1200_v43, %v1193_v41 }
  0xea   :  { %654 = vmatpush.msrb.mxu2 %v571_v45  ;;  %v560_v49 = vmax.f32 %v417_v27, 0.0  ;;  %v554_v27 = vmax.f32 %v402_v11, 0.0 }
  0xec   :  { %655 = vmatpush.msrb.mxu2 %v570_v52 }
  0xee   :  { %v491_v53 = vpop.f32.mrf.mxu2  ;;  %656 = vmatpush.msrb.mxu2 %v569_v51  ;;  %v1272_v54 = vpop.f32.mrf.mxu3  ;;  %v410_v51 = vadd.f32 %v1200_v43, %v1246_v15 }
  0xef   :  { %v419_v55 = vpop.f32.mrf.mxu0 }
  0xf0   :  { %v420_v24 = vadd.f32 %v1200_v43, %v419_v55  ;;  %v559_v55 = vmax.f32 %v415_v38, 0.0 }
  0xf2   :  { %v561_v39 = vmax.f32 %v420_v24, 0.0 }
  0xf6   :  { %v494_v42 = vpop.f32.mrf.mxu2  ;;  %v1274_v56 = vpop.f32.mrf.mxu3 }
  0xf7   :  { %v421_v60 = vpop.f32.mrf.mxu0  ;;  %v495_v52 = vadd.f32 %v1200_v43, %v494_v42  ;;  %v490_v42 = vadd.f32 %v1200_v43, %v489_v46  ;;  %v485_v46 = vadd.f32 %v1200_v43, %v1249_v18  ;;  %v480_v18 = vadd.f32 %v1200_v43, %v1236_v9 }
  0xf8   :  { %v422_v22 = vadd.f32 %v1200_v43, %v421_v60  ;;  %v492_v60 = vadd.f32 %v1200_v43, %v491_v53  ;;  %v475_v9 = vadd.f32 %v1200_v43, %v1224_v1  ;;  %v470_v1 = vadd.f32 %v1200_v43, %v1212_v57 }
  0xf9   :  { %v589_v24 = vmax.f32 %v490_v42, 0.0 }
  0xfa   :  { %v562_v28 = vmax.f32 %v422_v22, 0.0  ;;  %v590_v22 = vmax.f32 %v492_v60, 0.0 }
  0xfe   :  { %v496_v0 = vpop.f32.mrf.mxu2  ;;  %v1276_v4 = vpop.f32.mrf.mxu3 }
  0xff   :  { %v424_v8 = vpop.f32.mrf.mxu0  ;;  %v497_v40 = vadd.f32 %v1200_v43, %v496_v0 }
 0x100   :  { %v425_v17 = vadd.f32 %v1200_v43, %v424_v8  ;;  %v558_v8 = vmax.f32 %v412_v48, 0.0 }
 0x101   :  { %v592_v0 = vmax.f32 %v497_v40, 0.0 }
 0x102   :  { %v563_v25 = vmax.f32 %v425_v17, 0.0  ;;  %v557_v17 = vmax.f32 %v410_v51, 0.0  ;;  %v583_v51 = vmax.f32 %v475_v9, 0.0 }
 0x106   :  { %v499_v12 = vpop.f32.mrf.mxu2  ;;  %v1278_v37 = vpop.f32.mrf.mxu3 }
 0x107   :  { %v426_v16 = vpop.f32.mrf.mxu0  ;;  %v500_v26 = vadd.f32 %v1200_v43, %v499_v12  ;;  %v591_v12 = vmax.f32 %v495_v52, 0.0 }
 0x108   :  { %v427_v21 = vadd.f32 %v1200_v43, %v426_v16  ;;  %v405_v16 = vadd.f32 %v1200_v43, %v1234_v7  ;;  %v400_v7 = vadd.f32 %v1200_v43, %v1222_v63  ;;  %v395_v63 = vadd.f32 %v1200_v43, %v1208_v50 }
 0x109   :  { %v593_v44 = vmax.f32 %v500_v26, 0.0  ;;  %v390_v50 = vadd.f32 %v1200_v43, %v1184_v36 }
 0x10a   :  { %v564_v23 = vmax.f32 %v427_v21, 0.0  ;;  %v487_v21 = vadd.f32 %v1200_v43, %v1260_v31  ;;  %v482_v31 = vadd.f32 %v1200_v43, %v1242_v13  ;;  %v477_v13 = vadd.f32 %v1200_v43, %v1230_v5 }
 0x10b   :  { %v472_v5 = vadd.f32 %v1200_v43, %v1218_v61  ;;  %v549_v33 = vmax.f32 %v390_v50, 0.0 }
 0x10c   :  { %625 = vmatpush.msrb.mxu1 %v564_v23  ;;  %v556_v23 = vmax.f32 %v407_v20, 0.0  ;;  %v588_v26 = vmax.f32 %v487_v21, 0.0  ;;  %v586_v38 = vmax.f32 %v482_v31, 0.0  ;;  %v584_v48 = vmax.f32 %v477_v13, 0.0 }
 0x10d   :  { %v582_v60 = vmax.f32 %v472_v5, 0.0  ;;  %v619_v21 = vld.sshfl [vmem:[#allocation1 + $0x10] sm:$0xff pattern:$0x73625140] }
 0x10e   :  { %v501_v29 = vpop.f32.mrf.mxu2  ;;  %626 = vmatpush.msrb.mxu1 %v563_v25  ;;  %v1286_v30 = vpop.f32.mrf.mxu3  ;;  %v555_v25 = vmax.f32 %v405_v16, 0.0  ;;  %v581_v16 = vmax.f32 %v470_v1, 0.0 }
 0x10f   :  { %v502_v34 = vadd.f32 %v1200_v43, %v501_v29  ;;  %v1289_v35 = vpop.f32.mrf.mxu0 }
 0x110   :  { %627 = vmatpush.msrb.mxu1 %v562_v28  ;;  %v587_v28 = vmax.f32 %v485_v46, 0.0 }
 0x111   :  { %v594_v45 = vmax.f32 %v502_v34, 0.0  ;;  %v553_v34 = vmax.f32 %v400_v7, 0.0 }
 0x112   :  { %628 = vmatpush.msrb.mxu1 %v561_v39  ;;  %v552_v39 = vmax.f32 %v397_v3, 0.0 }
 0x113   :  { %667 = vmatpush.msrb.mxu3 %v594_v45  ;;  %v551_v45 = vmax.f32 %v395_v63, 0.0 }
 0x114   :  { %629 = vmatpush.msrb.mxu1 %v560_v49  ;;  %v550_v49 = vmax.f32 %v392_v59, 0.0 }
 0x115   :  { %668 = vmatpush.msrb.mxu3 %v593_v44  ;;  %v585_v44 = vmax.f32 %v480_v18, 0.0 }
 0x116   :  { %630 = vmatpush.msrb.mxu1 %v559_v55  ;;  %v544_v53 = vpop.f32.mrf.mxu3 }
 0x117   :  { %669 = vmatpush.msrb.mxu3 %v592_v0  ;;  %v1305_v15 = vpop.f32.mrf.mxu0  ;;  %v545_v55 = vadd.f32 %v1200_v43, %v544_v53  ;;  %v542_v0 = vadd.f32 %v1200_v43, %v1286_v30  ;;  %v430_v30 = vadd.f32 %v1200_v43, %v1289_v35  ;;  %v532_v35 = vadd.f32 %v1200_v43, %v1272_v54 }
 0x118   :  { %631 = vmatpush.msrb.mxu1 %v558_v8  ;;  %v617_v8 = vld.sshfl [vmem:[#allocation1] sm:$0xff pattern:$0x73625140]  ;;  %v432_v57 = vadd.f32 %v1200_v43, %v1305_v15  ;;  %v522_v54 = vadd.f32 %v1200_v43, %v1244_v14  ;;  %v512_v14 = vadd.f32 %v1200_v43, %v1220_v62  ;;  %v979_v62 = vld [vmem:[%s1391_s4 + $0x8] sm:$0xff] }
 0x119   :  { %670 = vmatpush.msrb.mxu3 %v591_v12  ;;  %v611_v53 = vmax.f32 %v545_v55, 0.0  ;;  %v610_v11 = vmax.f32 %v542_v0, 0.0  ;;  %v565_v46 = vmax.f32 %v430_v30, 0.0  ;;  %v606_v31 = vmax.f32 %v532_v35, 0.0 }
 0x11a   :  { %632 = vmatpush.msrb.mxu1 %v557_v17  ;;  %v540_v17 = vadd.f32 %v1200_v43, %v1278_v37  ;;  %v566_v15 = vmax.f32 %v432_v57, 0.0  ;;  %v535_v37 = vadd.f32 %v1200_v43, %v1274_v56  ;;  %v527_v56 = vadd.f32 %v1200_v43, %v1262_v32 }
 0x11b   :  { %671 = vmatpush.msrb.mxu3 %v590_v22  ;;  %v537_v22 = vadd.f32 %v1200_v43, %v1276_v4  ;;  %v530_v4 = vadd.f32 %v1200_v43, %v1268_v47  ;;  %v520_v47 = vadd.f32 %v1200_v43, %v1238_v10  ;;  %v517_v32 = vadd.f32 %v1200_v43, %v1232_v6 }
 0x11c   :  { %633 = vmatpush.msrb.mxu1 %v556_v23  ;;  %v609_v23 = vmax.f32 %v540_v17, 0.0  ;;  %v510_v10 = vadd.f32 %v1200_v43, %v1214_v58  ;;  %v598_v13 = vmax.f32 %v512_v14, 0.0 }
 0x11d   :  { %672 = vmatpush.msrb.mxu3 %v589_v24  ;;  %v618_v24 = vld.sshfl [vmem:[#allocation1 + $0x8] sm:$0xff pattern:$0x73625140]  ;;  %v608_v7 = vmax.f32 %v537_v22, 0.0  ;;  %v605_v3 = vmax.f32 %v530_v4, 0.0  ;;  %v600_v63 = vmax.f32 %v517_v32, 0.0 }
 0x11e   :  { %634 = vmatpush.msrb.mxu1 %v555_v25  ;;  %v546_v40 = vpop.f32.mrf.mxu3  ;;  %v607_v25 = vmax.f32 %v535_v37, 0.0  ;;  %v597_v6 = vmax.f32 %v510_v10, 0.0 }
 0x11f   :  { %673 = vmatpush.msrb.mxu3 %v588_v26  ;;  %v434_v29 = vpop.f32.mrf.mxu0  ;;  %v547_v41 = vadd.f32 %v1200_v43, %v546_v40  ;;  %v525_v26 = vadd.f32 %v1200_v43, %v1251_v19  ;;  %v515_v19 = vadd.f32 %v1200_v43, %v1226_v2  ;;  %v1019_v2 = vmov 0.0  }
 0x120   :  { %635 = vmatpush.msrb.mxu1 %v554_v27  ;;  %v435_v52 = vadd.f32 %v1200_v43, %v434_v29  ;;  %v604_v27 = vmax.f32 %v527_v56, 0.0  ;;  %v601_v29 = vmax.f32 %v520_v47, 0.0  ;;  %30 = vst.msk [vmem:[#allocation2] sm:$0x3] %vm29_vm2, %v1019_v2 }
 0x121   :  { %674 = vmatpush.msrb.mxu3 %v587_v28  ;;  %v612_v20 = vmax.f32 %v547_v41, 0.0  ;;  %v603_v18 = vmax.f32 %v525_v26, 0.0  ;;  %v602_v28 = vmax.f32 %v522_v54, 0.0 }
 0x122   :  { %636 = vmatpush.msrb.mxu1 %v553_v34  ;;  %v567_v42 = vmax.f32 %v435_v52, 0.0  ;;  %v599_v34 = vmax.f32 %v515_v19, 0.0 }
 0x123   :  { %675 = vmatpush.msrb.mxu3 %v586_v38  ;;  %v620_v38 = vld.sshfl [vmem:[#allocation1 + $0x18] sm:$0xff pattern:$0x73625140] }
 0x124   :  { %637 = vmatpush.msrb.mxu1 %v552_v39 }
 0x125   :  { %676 = vmatpush.msrb.mxu3 %v585_v44 }
 0x126   :  { %638 = vmatpush.msrb.mxu1 %v551_v45 }
 0x127   :  { %677 = vmatpush.msrb.mxu3 %v584_v48  ;;  %v436_v36 = vpop.f32.mrf.mxu0  ;;  %v613_v44 = vld [vmem:[#allocation2] sm:$0x3] }
 0x128   :  { %639 = vmatpush.msrb.mxu1 %v550_v49  ;;  %v437_v61 = vadd.f32 %v1200_v43, %v436_v36  ;;  %v978_v43 = vld [vmem:[%s1391_s4] sm:$0xff]  ;;  %s1020_s4 = smov [#allocation3]  }
 0x129   :  { %678 = vmatpush.msrb.mxu3 %v583_v51  ;;  %v992_v49 = vld [vmem:[%s1392_s5] ss:$0 sm:$0xff]  ;;  %s756_s23 = sshll.u32 %s1020_s4, 4  ;;  %s757_s23 = int_to_ptr.vmem [resolvable:$true] %s756_s23 }
 0x12a   :  { %640 = vmatpush.msrb.mxu1 %v549_v33  ;;  %v568_v12 = vmax.f32 %v437_v61, 0.0 }
 0x12b   :  { %679 = vmatpush.msrb.mxu3 %v582_v60  ;;  %641 = vmatmul.f32.vlgmr.msrb.gmra.mxu1 %v617_v8 }
 0x12c   :  { %685 = vmatpush.msra.mxu1 %v612_v20  ;;  %657 = vmatpush.msrb.mxu2 %v568_v12 }
 0x12d   :  { %680 = vmatpush.msrb.mxu3 %v581_v16 }
 0x12e   :  { %686 = vmatpush.msra.mxu1 %v611_v53  ;;  %658 = vmatpush.msrb.mxu2 %v567_v42 }
 0x12f   :  { %681 = vmatmul.f32.vlgmr.msrb.gmra.mxu3 %v619_v21 }
 0x130   :  { %687 = vmatpush.msra.mxu1 %v610_v11  ;;  %659 = vmatpush.msrb.mxu2 %v566_v15 }
 0x132   :  { %688 = vmatpush.msra.mxu1 %v609_v23  ;;  %660 = vmatpush.msrb.mxu2 %v565_v46 }
 0x133   :  { %661 = vmatmul.f32.vlgmr.msrb.gmra.mxu2 %v618_v24 }
 0x134   :  { %689 = vmatpush.msra.mxu1 %v608_v7  ;;  %743 = vmatpush.bf16.msra.mxu2 %v979_v62 }
 0x136   :  { %690 = vmatpush.msra.mxu1 %v607_v25 }
 0x138   :  { %691 = vmatpush.msra.mxu1 %v606_v31  ;;  %744 = vmatpush.bf16.msra.mxu2 %v978_v43 }
 0x13a   :  { %692 = vmatpush.msra.mxu1 %v605_v3 }
 0x13c   :  { %693 = vmatpush.msra.mxu1 %v604_v27 }
 0x13e   :  { %694 = vmatpush.msra.mxu1 %v603_v18 }
 0x140   :  { %695 = vmatpush.msra.mxu1 %v602_v28 }
 0x142   :  { %696 = vmatpush.msra.mxu1 %v601_v29 }
 0x144   :  { %697 = vmatpush.msra.mxu1 %v600_v63 }
 0x146   :  { %698 = vmatpush.msra.mxu1 %v599_v34 }
 0x148   :  { %699 = vmatpush.msra.mxu1 %v598_v13 }
 0x14a   :  { %700 = vmatpush.msra.mxu1 %v597_v6 }
 0x14b   :  { %701 = vmatmul.f32.vlgmr.msra.gmra.mxu1 %v620_v38 }
 0x1a8   :  { %v642_v58 = vpop.f32.mrf.mxu1 }
 0x1b2   :  { %v682_v40 = vpop.f32.mrf.mxu3 }
 0x1b6   :  { %v662_v59 = vpop.f32.mrf.mxu2 }
 0x1b7   :  { %v663_v39 = vadd.f32 %v662_v59, %v642_v58 }
 0x1b9   :  { %v683_v9 = vadd.f32 %v682_v40, %v663_v39 }
 0x1c8   :  { %v702_v50 = vpop.f32.mrf.mxu1 }
 0x1c9   :  { %v703_v45 = vadd.f32 %v702_v50, %v683_v9 }
 0x1cb   :  { %v705_v5 = vadd.f32 %v703_v45, %v613_v44 }
 0x1cd   :  { %707 = vst.msk [vmem:[#allocation2] sm:$0x3] %vm29_vm2, %v705_v5 }
 0x1d4   :  { %v711_v48 = vld [vmem:[#allocation2] sm:$0x3] }
 0x1d5   :  { %v712_v41 = vpack.c.bf16 %v711_v48, %v711_v48 }
 0x1d7   :  { %943 = vmatmul.msk.bf16.vlgmr.msra.gmra.mxu2 %vm733_vm3, %v712_v41 }
 0x25a   :  { %v746_v52 = vpop.f32.mrf.mxu2 }
 0x25b   :  { %v747_v1 = vadd.f32 %v992_v49, %v746_v52 }
 0x25d   :  { %750 = vst [vmem:[#allocation3] sm:$0x3] %v747_v1 }
 0x25e   :  { %761 = dma.vmem_to_hbm [thread:$0]  %s757_s23, 32, %s759_s26, [#allocation4]  }
 0x262   :  { %v748_v51 = vpop.f32.mrf.mxu2 }
 0x263   :  { %1017 = dma.done.wait [#allocation4], 32  }
 0x264   :  { %1018 = vsyncadd [#allocation4], 4294967264 }
 0x265   :  { %766 = vsyncpa [#allocation4], 1 }

</bundles_post_ra>
